<compile_context>
chip_gen: v5e
topology: v5e:2x2
jax: 0.10.0
libtpu: 0.0.40
codegen_flags: <defaults>
</compile_context>

<pallas_src>
import functools
import math

import jax
import jax.numpy as jnp
from jax.experimental import pallas as pl
from jax.experimental.pallas import tpu as pltpu


# ----------------------------------------------------------------------------
# Pallas kernel: one row tile of the batch through one transformer block.
# grid = (num_row_tiles, num_blocks); the hidden state is carried across the
# block axis in a VMEM scratch.
# ----------------------------------------------------------------------------
def _encoder_blocks_kernel(
    x_ref,      # (rows, D)     raw embeddings for this row tile
    pe_ref,     # (S, D)        sinusoidal positional encoding
    wqkv_ref,   # (1, D, 3D)    bf16 fused Q|K|V projection weight (this block)
    wo_ref,     # (1, D, D)     bf16 output projection weight
    w1_ref,     # (1, D, F)     bf16 FFN first weight
    w2_ref,     # (1, F, D)     bf16 FFN second weight
    vecs_ref,   # (1, 8, D)     f32 rows: bq, bk, bv, bo, ln_g, ln_b, b2, pad
    b1_ref,     # (1, 1, F)     f32 FFN first bias
    o_ref,      # (rows, D)     output (written on the last block only)
    h_ref,      # (rows, D)     f32 VMEM scratch: hidden state carry
    *, heads: int, seq: int, batch_per_tile: int,
):
    blk = pl.program_id(1)
    nblk = pl.num_programs(1)

    rows, d = h_ref.shape
    dh = d // heads
    bt = batch_per_tile

    # --- first block of each row tile: fold sqrt(D) scale + positional enc ---
    @pl.when(blk == 0)
    def _():
        x = x_ref[...].reshape(bt, seq, d)
        h0 = x * jnp.float32(math.sqrt(d)) + pe_ref[...].reshape(1, seq, d)
        h_ref[...] = h0.reshape(rows, d)

    h = h_ref[...]                                    # (rows, D) f32

    vecs = vecs_ref[0]                                # (8, D) f32
    bq, bk, bv, bo = vecs[0:1], vecs[1:2], vecs[2:3], vecs[3:4]
    gamma, beta, b2 = vecs[4:5], vecs[5:6], vecs[6:7]
    b1 = b1_ref[0]                                    # (1, F) f32

    # --- fused Q/K/V projection: one wide bf16 MXU op ---
    qkv = jnp.dot(h.astype(jnp.bfloat16), wqkv_ref[0],
                  preferred_element_type=jnp.float32)          # (rows, 3D) f32
    q = (qkv[:, 0 * d:1 * d] + bq).reshape(bt, seq, d)
    k = (qkv[:, 1 * d:2 * d] + bk).reshape(bt, seq, d)
    v = (qkv[:, 2 * d:3 * d] + bv).reshape(bt, seq, d)

    # --- multi-head attention (batched over the tile's batch per head) ---
    # TODO(synk): head-major relayout / one batched dot over (bt*heads) would
    #             remove the dh-lane slices; kept per-head here for lowering
    #             robustness at these tiny shapes.
    scale = jnp.float32(1.0 / math.sqrt(dh))
    ctx_heads = []
    for hh in range(heads):                            # static unroll
        lo = hh * dh
        qh = q[:, :, lo:lo + dh]                       # (bt, S, dh)
        kh = k[:, :, lo:lo + dh]
        vh = v[:, :, lo:lo + dh]
        s = jnp.einsum('bqd,bkd->bqk', qh, kh,
                       preferred_element_type=jnp.float32) * scale
        s = s - jnp.max(s, axis=-1, keepdims=True)
        p = jnp.exp(s)
        p = p / jnp.sum(p, axis=-1, keepdims=True)     # exact divide
        ctx_heads.append(jnp.einsum('bqk,bkd->bqd', p, vh,
                                    preferred_element_type=jnp.float32))
    ctx = jnp.concatenate(ctx_heads, axis=-1).reshape(rows, d)

    # --- single output projection for all heads ---
    attn = jnp.dot(ctx.astype(jnp.bfloat16), wo_ref[0],
                   preferred_element_type=jnp.float32) + bo

    # --- residual with `value` (== block input) ---
    res = attn + h

    def layernorm(y):
        mu = jnp.mean(y, axis=-1, keepdims=True)
        var = jnp.mean((y - mu) ** 2, axis=-1, keepdims=True)
        return (y - mu) * jax.lax.rsqrt(var + 1e-5) * gamma + beta

    n1 = layernorm(res)                 # dropout(p=0.2) -> identity (eval)

    # --- feed-forward: Linear -> ReLU -> Linear ---
    ff = jnp.dot(n1.astype(jnp.bfloat16), w1_ref[0],
                 preferred_element_type=jnp.float32) + b1
    ff = jnp.maximum(ff, 0.0)
    ff = jnp.dot(ff.astype(jnp.bfloat16), w2_ref[0],
                 preferred_element_type=jnp.float32) + b2

    # second LayerNorm (same gamma/beta), NO residual -- matches the module.
    h_new = layernorm(ff)
    h_ref[...] = h_new

    @pl.when(blk == nblk - 1)
    def _():
        o_ref[...] = h_new


def encoder_blocks(x, pe, packed, *, heads, batch, seq):
    """x: (B*S, D) f32 raw embeddings.  Returns (B*S, D) f32."""
    wqkv, wo, w1, w2, vecs, b1 = packed
    nb, dmod = wqkv.shape[0], wqkv.shape[1]
    bs = x.shape[0]

    # Row tiling: one batch element per tile when the per-tile row count (S)
    # is sublane aligned; otherwise a single full tile. The leading grid axis
    # is "parallel" so v7x's 2 TensorCores split the row tiles.
    if batch > 1 and seq % 8 == 0:
        batch_per_tile = 1
    else:
        batch_per_tile = batch
    rows = batch_per_tile * seq
    num_tiles = batch // batch_per_tile

    kernel = functools.partial(
        _encoder_blocks_kernel,
        heads=heads, seq=seq, batch_per_tile=batch_per_tile)

    def wspec(shape):
        return pl.BlockSpec((1,) + tuple(shape[1:]), lambda r, b: (b, 0, 0))

    return pl.pallas_call(
        kernel,
        out_shape=jax.ShapeDtypeStruct((bs, dmod), jnp.float32),
        grid_spec=pltpu.PrefetchScalarGridSpec(
            num_scalar_prefetch=0,
            grid=(num_tiles, nb),                      # blocks streamed on grid
            in_specs=[
                pl.BlockSpec((rows, dmod), lambda r, b: (r, 0)),   # x
                pl.BlockSpec(pe.shape, lambda r, b: (0, 0)),        # pe
                wspec(wqkv.shape),                                  # Wq|Wk|Wv
                wspec(wo.shape),                                    # Wo
                wspec(w1.shape),                                    # W1
                wspec(w2.shape),                                    # W2
                wspec(vecs.shape),                                  # small vecs
                wspec(b1.shape),                                    # b1
            ],
            out_specs=pl.BlockSpec((rows, dmod), lambda r, b: (r, 0)),
            scratch_shapes=[pltpu.VMEM((rows, dmod), jnp.float32)],
        ),
        compiler_params=pltpu.CompilerParams(
            dimension_semantics=("parallel", "arbitrary"),
            vmem_limit_bytes=32 * 1024 * 1024),
    )(x, pe, wqkv, wo, w1, w2, vecs, b1)


# ----------------------------------------------------------------------------
# Parameter construction (deterministic), host-side packing, and glue.
# ----------------------------------------------------------------------------
def make_params(key, *, vocab, d_model, ff_dim, num_blocks):
    keys = jax.random.split(key, 1 + num_blocks)
    emb = jax.random.normal(keys[0], (vocab, d_model), jnp.float32)

    blocks = []
    for i in range(num_blocks):
        ks = jax.random.split(keys[1 + i], 8)
        lim_d = 1.0 / math.sqrt(d_model)
        lim_f = 1.0 / math.sqrt(ff_dim)
        u = lambda k, shp, lim: jax.random.uniform(k, shp, jnp.float32, -lim, lim)
        blocks.append(dict(
            wq=u(ks[0], (d_model, d_model), lim_d), bq=jnp.zeros((1, d_model), jnp.float32),
            wk=u(ks[1], (d_model, d_model), lim_d), bk=jnp.zeros((1, d_model), jnp.float32),
            wv=u(ks[2], (d_model, d_model), lim_d), bv=jnp.zeros((1, d_model), jnp.float32),
            wo=u(ks[3], (d_model, d_model), lim_d), bo=jnp.zeros((1, d_model), jnp.float32),
            ln_g=jnp.ones((1, d_model), jnp.float32),
            ln_b=jnp.zeros((1, d_model), jnp.float32),
            w1=u(ks[4], (d_model, ff_dim), lim_d), b1=u(ks[5], (1, ff_dim), lim_d),
            w2=u(ks[6], (ff_dim, d_model), lim_f), b2=u(ks[7], (1, d_model), lim_f),
        ))
    return emb, blocks


def pack_block_params(blocks):
    """Stack per-block weights on a leading axis; big matmul weights in bf16."""
    wqkv = jnp.stack([jnp.concatenate([b["wq"], b["wk"], b["wv"]], axis=1)
                      for b in blocks])                                # (NB,D,3D)
    wo = jnp.stack([b["wo"] for b in blocks])                          # (NB,D,D)
    w1 = jnp.stack([b["w1"] for b in blocks])                          # (NB,D,F)
    w2 = jnp.stack([b["w2"] for b in blocks])                          # (NB,F,D)
    b1 = jnp.stack([b["b1"] for b in blocks])                          # (NB,1,F)
    vecs = jnp.stack([
        jnp.concatenate([b["bq"], b["bk"], b["bv"], b["bo"],
                         b["ln_g"], b["ln_b"], b["b2"],
                         jnp.zeros_like(b["b2"])], axis=0)             # (8, D)
        for b in blocks])                                              # (NB,8,D)
    bf = lambda a: a.astype(jnp.bfloat16)
    return bf(wqkv), bf(wo), bf(w1), bf(w2), vecs, b1


def sinusoidal_pe(seq_len, d_model):
    pos = jnp.arange(seq_len, dtype=jnp.float32)[:, None]          # (S, 1)
    i = jnp.arange(0, d_model, 2, dtype=jnp.float32)[None, :]      # (1, D/2)
    angle = pos / jnp.power(10000.0, i / d_model)
    pe = jnp.zeros((seq_len, d_model), jnp.float32)
    pe = pe.at[:, 0::2].set(jnp.sin(angle))
    pe = pe.at[:, 1::2].set(jnp.cos(angle))
    return pe


def encoder_forward(token_ids, emb_table, packed, pe, *, heads):
    # Embedding lookup stays a single XLA gather; sqrt(D) scale + PE add are
    # folded into the kernel's first grid step.
    B, S = token_ids.shape
    D = emb_table.shape[1]
    x = jnp.take(emb_table, token_ids.reshape(-1), axis=0)          # (B*S, D)
    out = encoder_blocks(x, pe, packed, heads=heads, batch=B, seq=S)
    return out.reshape(B, S, D)


# ----------------------------------------------------------------------------
if __name__ == "__main__":
    # Small config consistent with Encoder(panjang_sekuens, ukuran_vocab, ...)
    SEQ_LEN = 8         # panjang_sekuens
    VOCAB = 50          # ukuran_vocab
    D_MODEL = 32        # dimensi_embedding
    NUM_BLOCKS = 2      # jumlah_block
    EXPANSION = 4       # faktor_ekspansi
    HEADS = 4           # heads (D_MODEL % HEADS == 0)
    BATCH = 2
    FF_DIM = EXPANSION * D_MODEL

    key = jax.random.PRNGKey(0)
    k_tok, k_par = jax.random.split(key)

    token_ids = jax.random.randint(k_tok, (BATCH, SEQ_LEN), 0, VOCAB, jnp.int32)
    emb_table, block_params = make_params(
        k_par, vocab=VOCAB, d_model=D_MODEL, ff_dim=FF_DIM, num_blocks=NUM_BLOCKS)
    packed = pack_block_params(block_params)
    pe = sinusoidal_pe(SEQ_LEN, D_MODEL)

    fwd = jax.jit(functools.partial(encoder_forward, heads=HEADS))
    out = jax.block_until_ready(fwd(token_ids, emb_table, packed, pe))

    assert out.shape == (BATCH, SEQ_LEN, D_MODEL) and out.dtype == jnp.float32
    assert bool(jnp.all(jnp.isfinite(out)))
    print("KERNEL_OK")
</pallas_src>

<mosaic_0001>
module attributes {stable_mosaic.version = 11 : i64} {
  func.func @_encoder_blocks_kernel(%arg0: i32, %arg1: i32, %arg2: memref<8x32xf32, #tpu.memory_space<vmem>>, %arg3: memref<8x32xf32, #tpu.memory_space<vmem>>, %arg4: memref<1x32x96xbf16, #tpu.memory_space<vmem>>, %arg5: memref<1x32x32xbf16, #tpu.memory_space<vmem>>, %arg6: memref<1x32x128xbf16, #tpu.memory_space<vmem>>, %arg7: memref<1x128x32xbf16, #tpu.memory_space<vmem>>, %arg8: memref<1x8x32xf32, #tpu.memory_space<vmem>>, %arg9: memref<1x1x128xf32, #tpu.memory_space<vmem>>, %arg10: memref<8x32xf32, #tpu.memory_space<vmem>>, %arg11: memref<8x32xf32, #tpu.memory_space<vmem>>) attributes {dimension_semantics = [#tpu.dimension_semantics<parallel>, #tpu.dimension_semantics<arbitrary>], iteration_bounds = array<i64: 2, 2>, scalar_prefetch = 0 : i64, scratch_operands = 1 : i64, tpu.core_type = #tpu.core_type<tc>, window_params = [{transform_indices = @transform_0, window_bounds = array<i64: 8, 32>}, {pipeline_mode = #tpu.pipeline_mode<synchronous>, transform_indices = @transform_1, window_bounds = array<i64: 8, 32>}, {transform_indices = @transform_2, window_bounds = array<i64: 1, 32, 96>}, {transform_indices = @transform_3, window_bounds = array<i64: 1, 32, 32>}, {transform_indices = @transform_4, window_bounds = array<i64: 1, 32, 128>}, {transform_indices = @transform_5, window_bounds = array<i64: 1, 128, 32>}, {transform_indices = @transform_6, window_bounds = array<i64: 1, 8, 32>}, {transform_indices = @transform_7, window_bounds = array<i64: 1, 1, 128>}, {transform_indices = @transform_8, window_bounds = array<i64: 8, 32>}]} {
    %c0_i32 = arith.constant 0 : i32
    %0 = arith.cmpi eq, %arg1, %c0_i32 : i32
    %1 = arith.extui %0 : i1 to i32
    %c0_i32_0 = arith.constant 0 : i32
    %2 = arith.cmpi ne, %1, %c0_i32_0 : i32
    scf.if %2 {
      %c0_57 = arith.constant 0 : index
      %c0_58 = arith.constant 0 : index
      %166 = vector.load %arg2[%c0_57, %c0_58] : memref<8x32xf32, #tpu.memory_space<vmem>>, vector<8x32xf32>
      %167 = vector.shape_cast %166 : vector<8x32xf32> to vector<1x8x32xf32>
      %cst_59 = arith.constant 5.65685415 : f32
      %168 = vector.broadcast %cst_59 : f32 to vector<1x8x32xf32>
      %169 = arith.mulf %167, %168 : vector<1x8x32xf32>
      %c0_60 = arith.constant 0 : index
      %c0_61 = arith.constant 0 : index
      %170 = vector.load %arg3[%c0_60, %c0_61] : memref<8x32xf32, #tpu.memory_space<vmem>>, vector<8x32xf32>
      %171 = vector.shape_cast %170 : vector<8x32xf32> to vector<1x8x32xf32>
      %172 = arith.addf %169, %171 : vector<1x8x32xf32>
      %173 = vector.shape_cast %172 : vector<1x8x32xf32> to vector<8x32xf32>
      %c0_62 = arith.constant 0 : index
      %c0_63 = arith.constant 0 : index
      %174 = vector.load %arg11[%c0_62, %c0_63] : memref<8x32xf32, #tpu.memory_space<vmem>>, vector<8x32xf32>
      tpu.vector_store %arg11[%c0_62, %c0_63], %173 {strides = array<i32>} : memref<8x32xf32, #tpu.memory_space<vmem>>, vector<8x32xf32>,
    } else {
    }
    %c0 = arith.constant 0 : index
    %c0_1 = arith.constant 0 : index
    %3 = vector.load %arg11[%c0, %c0_1] : memref<8x32xf32, #tpu.memory_space<vmem>>, vector<8x32xf32>
    %c0_2 = arith.constant 0 : index
    %c0_3 = arith.constant 0 : index
    %c0_4 = arith.constant 0 : index
    %4 = vector.load %arg8[%c0_2, %c0_3, %c0_4] : memref<1x8x32xf32, #tpu.memory_space<vmem>>, vector<1x8x32xf32>
    %5 = vector.shape_cast %4 : vector<1x8x32xf32> to vector<8x32xf32>
    %6 = vector.extract_strided_slice %5 {offsets = [0, 0], sizes = [1, 32], strides = [1, 1]} : vector<8x32xf32> to vector<1x32xf32>
    %7 = vector.extract_strided_slice %5 {offsets = [1, 0], sizes = [1, 32], strides = [1, 1]} : vector<8x32xf32> to vector<1x32xf32>
    %8 = vector.extract_strided_slice %5 {offsets = [2, 0], sizes = [1, 32], strides = [1, 1]} : vector<8x32xf32> to vector<1x32xf32>
    %9 = vector.extract_strided_slice %5 {offsets = [3, 0], sizes = [1, 32], strides = [1, 1]} : vector<8x32xf32> to vector<1x32xf32>
    %10 = vector.extract_strided_slice %5 {offsets = [4, 0], sizes = [1, 32], strides = [1, 1]} : vector<8x32xf32> to vector<1x32xf32>
    %11 = vector.extract_strided_slice %5 {offsets = [5, 0], sizes = [1, 32], strides = [1, 1]} : vector<8x32xf32> to vector<1x32xf32>
    %12 = vector.extract_strided_slice %5 {offsets = [6, 0], sizes = [1, 32], strides = [1, 1]} : vector<8x32xf32> to vector<1x32xf32>
    %c0_5 = arith.constant 0 : index
    %c0_6 = arith.constant 0 : index
    %c0_7 = arith.constant 0 : index
    %13 = vector.load %arg9[%c0_5, %c0_6, %c0_7] : memref<1x1x128xf32, #tpu.memory_space<vmem>>, vector<1x1x128xf32>
    %14 = vector.shape_cast %13 : vector<1x1x128xf32> to vector<1x128xf32>
    %15 = arith.truncf %3 : vector<8x32xf32> to vector<8x32xbf16>
    %c0_8 = arith.constant 0 : index
    %c0_9 = arith.constant 0 : index
    %c0_10 = arith.constant 0 : index
    %16 = vector.load %arg4[%c0_8, %c0_9, %c0_10] : memref<1x32x96xbf16, #tpu.memory_space<vmem>>, vector<1x32x96xbf16>
    %17 = vector.shape_cast %16 : vector<1x32x96xbf16> to vector<32x96xbf16>
    %cst = arith.constant dense<0.000000e+00> : vector<8x96xf32>
    %18 = tpu.matmul %15, %17, %cst {dimension_numbers = #tpu.dot_dimension_numbers<[1], [0], [0], [1], [0, 0, 1, 1], [], []>} : vector<8x32xbf16>, vector<32x96xbf16>, vector<8x96xf32> -> vector<8x96xf32>
    %19 = vector.extract_strided_slice %18 {offsets = [0, 0], sizes = [8, 32], strides = [1, 1]} : vector<8x96xf32> to vector<8x32xf32>
    %20 = vector.broadcast %6 : vector<1x32xf32> to vector<8x32xf32>
    %21 = arith.addf %19, %20 : vector<8x32xf32>
    %22 = vector.shape_cast %21 : vector<8x32xf32> to vector<1x8x32xf32>
    %23 = vector.extract_strided_slice %18 {offsets = [0, 32], sizes = [8, 32], strides = [1, 1]} : vector<8x96xf32> to vector<8x32xf32>
    %24 = vector.broadcast %7 : vector<1x32xf32> to vector<8x32xf32>
    %25 = arith.addf %23, %24 : vector<8x32xf32>
    %26 = vector.shape_cast %25 : vector<8x32xf32> to vector<1x8x32xf32>
    %27 = vector.extract_strided_slice %18 {offsets = [0, 64], sizes = [8, 32], strides = [1, 1]} : vector<8x96xf32> to vector<8x32xf32>
    %28 = vector.broadcast %8 : vector<1x32xf32> to vector<8x32xf32>
    %29 = arith.addf %27, %28 : vector<8x32xf32>
    %30 = vector.shape_cast %29 : vector<8x32xf32> to vector<1x8x32xf32>
    %31 = vector.extract_strided_slice %22 {offsets = [0, 0, 0], sizes = [1, 8, 8], strides = [1, 1, 1]} : vector<1x8x32xf32> to vector<1x8x8xf32>
    %32 = vector.extract_strided_slice %26 {offsets = [0, 0, 0], sizes = [1, 8, 8], strides = [1, 1, 1]} : vector<1x8x32xf32> to vector<1x8x8xf32>
    %33 = vector.extract_strided_slice %30 {offsets = [0, 0, 0], sizes = [1, 8, 8], strides = [1, 1, 1]} : vector<1x8x32xf32> to vector<1x8x8xf32>
    "tpu.trace_start"() <{level = 10 : i32, message = "bqd,bkd->bqk"}> : () -> ()
    %cst_11 = arith.constant dense<0.000000e+00> : vector<1x8x8xf32>
    %34 = tpu.matmul %31, %32, %cst_11 {dimension_numbers = #tpu.dot_dimension_numbers<[2], [2], [1], [1], [0, 0, 0, 1, 1, 1], [0], [0]>} : vector<1x8x8xf32>, vector<1x8x8xf32>, vector<1x8x8xf32> -> vector<1x8x8xf32>
    "tpu.trace_stop"() : () -> ()
    %cst_12 = arith.constant 0.353553385 : f32
    %35 = vector.broadcast %cst_12 : f32 to vector<1x8x8xf32>
    %36 = arith.mulf %34, %35 : vector<1x8x8xf32>
    %cst_13 = arith.constant dense<0xFF800000> : vector<1x8xf32>
    %37 = vector.multi_reduction <maximumf>, %36, %cst_13 [2] : vector<1x8x8xf32> to vector<1x8xf32>
    %38 = vector.shape_cast %37 : vector<1x8xf32> to vector<1x8x1xf32>
    %39 = vector.broadcast %38 : vector<1x8x1xf32> to vector<1x8x8xf32>
    %40 = arith.subf %36, %39 : vector<1x8x8xf32>
    %41 = math.exp %40 : vector<1x8x8xf32>
    %cst_14 = arith.constant dense<0.000000e+00> : vector<1x8xf32>
    %42 = vector.multi_reduction <add>, %41, %cst_14 [2] : vector<1x8x8xf32> to vector<1x8xf32>
    %43 = vector.shape_cast %42 : vector<1x8xf32> to vector<1x8x1xf32>
    %44 = vector.broadcast %43 : vector<1x8x1xf32> to vector<1x8x8xf32>
    %45 = arith.divf %41, %44 : vector<1x8x8xf32>
    "tpu.trace_start"() <{level = 10 : i32, message = "bqk,bkd->bqd"}> : () -> ()
    %cst_15 = arith.constant dense<0.000000e+00> : vector<1x8x8xf32>
    %46 = tpu.matmul %45, %33, %cst_15 {dimension_numbers = #tpu.dot_dimension_numbers<[2], [1], [1], [2], [0, 0, 0, 1, 1, 2], [0], [0]>} : vector<1x8x8xf32>, vector<1x8x8xf32>, vector<1x8x8xf32> -> vector<1x8x8xf32>
    "tpu.trace_stop"() : () -> ()
    %47 = vector.extract_strided_slice %22 {offsets = [0, 0, 8], sizes = [1, 8, 8], strides = [1, 1, 1]} : vector<1x8x32xf32> to vector<1x8x8xf32>
    %48 = vector.extract_strided_slice %26 {offsets = [0, 0, 8], sizes = [1, 8, 8], strides = [1, 1, 1]} : vector<1x8x32xf32> to vector<1x8x8xf32>
    %49 = vector.extract_strided_slice %30 {offsets = [0, 0, 8], sizes = [1, 8, 8], strides = [1, 1, 1]} : vector<1x8x32xf32> to vector<1x8x8xf32>
    "tpu.trace_start"() <{level = 10 : i32, message = "bqd,bkd->bqk"}> : () -> ()
    %cst_16 = arith.constant dense<0.000000e+00> : vector<1x8x8xf32>
    %50 = tpu.matmul %47, %48, %cst_16 {dimension_numbers = #tpu.dot_dimension_numbers<[2], [2], [1], [1], [0, 0, 0, 1, 1, 1], [0], [0]>} : vector<1x8x8xf32>, vector<1x8x8xf32>, vector<1x8x8xf32> -> vector<1x8x8xf32>
    "tpu.trace_stop"() : () -> ()
    %cst_17 = arith.constant 0.353553385 : f32
    %51 = vector.broadcast %cst_17 : f32 to vector<1x8x8xf32>
    %52 = arith.mulf %50, %51 : vector<1x8x8xf32>
    %cst_18 = arith.constant dense<0xFF800000> : vector<1x8xf32>
    %53 = vector.multi_reduction <maximumf>, %52, %cst_18 [2] : vector<1x8x8xf32> to vector<1x8xf32>
    %54 = vector.shape_cast %53 : vector<1x8xf32> to vector<1x8x1xf32>
    %55 = vector.broadcast %54 : vector<1x8x1xf32> to vector<1x8x8xf32>
    %56 = arith.subf %52, %55 : vector<1x8x8xf32>
    %57 = math.exp %56 : vector<1x8x8xf32>
    %cst_19 = arith.constant dense<0.000000e+00> : vector<1x8xf32>
    %58 = vector.multi_reduction <add>, %57, %cst_19 [2] : vector<1x8x8xf32> to vector<1x8xf32>
    %59 = vector.shape_cast %58 : vector<1x8xf32> to vector<1x8x1xf32>
    %60 = vector.broadcast %59 : vector<1x8x1xf32> to vector<1x8x8xf32>
    %61 = arith.divf %57, %60 : vector<1x8x8xf32>
    "tpu.trace_start"() <{level = 10 : i32, message = "bqk,bkd->bqd"}> : () -> ()
    %cst_20 = arith.constant dense<0.000000e+00> : vector<1x8x8xf32>
    %62 = tpu.matmul %61, %49, %cst_20 {dimension_numbers = #tpu.dot_dimension_numbers<[2], [1], [1], [2], [0, 0, 0, 1, 1, 2], [0], [0]>} : vector<1x8x8xf32>, vector<1x8x8xf32>, vector<1x8x8xf32> -> vector<1x8x8xf32>
    "tpu.trace_stop"() : () -> ()
    %63 = vector.extract_strided_slice %22 {offsets = [0, 0, 16], sizes = [1, 8, 8], strides = [1, 1, 1]} : vector<1x8x32xf32> to vector<1x8x8xf32>
    %64 = vector.extract_strided_slice %26 {offsets = [0, 0, 16], sizes = [1, 8, 8], strides = [1, 1, 1]} : vector<1x8x32xf32> to vector<1x8x8xf32>
    %65 = vector.extract_strided_slice %30 {offsets = [0, 0, 16], sizes = [1, 8, 8], strides = [1, 1, 1]} : vector<1x8x32xf32> to vector<1x8x8xf32>
    "tpu.trace_start"() <{level = 10 : i32, message = "bqd,bkd->bqk"}> : () -> ()
    %cst_21 = arith.constant dense<0.000000e+00> : vector<1x8x8xf32>
    %66 = tpu.matmul %63, %64, %cst_21 {dimension_numbers = #tpu.dot_dimension_numbers<[2], [2], [1], [1], [0, 0, 0, 1, 1, 1], [0], [0]>} : vector<1x8x8xf32>, vector<1x8x8xf32>, vector<1x8x8xf32> -> vector<1x8x8xf32>
    "tpu.trace_stop"() : () -> ()
    %cst_22 = arith.constant 0.353553385 : f32
    %67 = vector.broadcast %cst_22 : f32 to vector<1x8x8xf32>
    %68 = arith.mulf %66, %67 : vector<1x8x8xf32>
    %cst_23 = arith.constant dense<0xFF800000> : vector<1x8xf32>
    %69 = vector.multi_reduction <maximumf>, %68, %cst_23 [2] : vector<1x8x8xf32> to vector<1x8xf32>
    %70 = vector.shape_cast %69 : vector<1x8xf32> to vector<1x8x1xf32>
    %71 = vector.broadcast %70 : vector<1x8x1xf32> to vector<1x8x8xf32>
    %72 = arith.subf %68, %71 : vector<1x8x8xf32>
    %73 = math.exp %72 : vector<1x8x8xf32>
    %cst_24 = arith.constant dense<0.000000e+00> : vector<1x8xf32>
    %74 = vector.multi_reduction <add>, %73, %cst_24 [2] : vector<1x8x8xf32> to vector<1x8xf32>
    %75 = vector.shape_cast %74 : vector<1x8xf32> to vector<1x8x1xf32>
    %76 = vector.broadcast %75 : vector<1x8x1xf32> to vector<1x8x8xf32>
    %77 = arith.divf %73, %76 : vector<1x8x8xf32>
    "tpu.trace_start"() <{level = 10 : i32, message = "bqk,bkd->bqd"}> : () -> ()
    %cst_25 = arith.constant dense<0.000000e+00> : vector<1x8x8xf32>
    %78 = tpu.matmul %77, %65, %cst_25 {dimension_numbers = #tpu.dot_dimension_numbers<[2], [1], [1], [2], [0, 0, 0, 1, 1, 2], [0], [0]>} : vector<1x8x8xf32>, vector<1x8x8xf32>, vector<1x8x8xf32> -> vector<1x8x8xf32>
    "tpu.trace_stop"() : () -> ()
    %79 = vector.extract_strided_slice %22 {offsets = [0, 0, 24], sizes = [1, 8, 8], strides = [1, 1, 1]} : vector<1x8x32xf32> to vector<1x8x8xf32>
    %80 = vector.extract_strided_slice %26 {offsets = [0, 0, 24], sizes = [1, 8, 8], strides = [1, 1, 1]} : vector<1x8x32xf32> to vector<1x8x8xf32>
    %81 = vector.extract_strided_slice %30 {offsets = [0, 0, 24], sizes = [1, 8, 8], strides = [1, 1, 1]} : vector<1x8x32xf32> to vector<1x8x8xf32>
    "tpu.trace_start"() <{level = 10 : i32, message = "bqd,bkd->bqk"}> : () -> ()
    %cst_26 = arith.constant dense<0.000000e+00> : vector<1x8x8xf32>
    %82 = tpu.matmul %79, %80, %cst_26 {dimension_numbers = #tpu.dot_dimension_numbers<[2], [2], [1], [1], [0, 0, 0, 1, 1, 1], [0], [0]>} : vector<1x8x8xf32>, vector<1x8x8xf32>, vector<1x8x8xf32> -> vector<1x8x8xf32>
    "tpu.trace_stop"() : () -> ()
    %cst_27 = arith.constant 0.353553385 : f32
    %83 = vector.broadcast %cst_27 : f32 to vector<1x8x8xf32>
    %84 = arith.mulf %82, %83 : vector<1x8x8xf32>
    %cst_28 = arith.constant dense<0xFF800000> : vector<1x8xf32>
    %85 = vector.multi_reduction <maximumf>, %84, %cst_28 [2] : vector<1x8x8xf32> to vector<1x8xf32>
    %86 = vector.shape_cast %85 : vector<1x8xf32> to vector<1x8x1xf32>
    %87 = vector.broadcast %86 : vector<1x8x1xf32> to vector<1x8x8xf32>
    %88 = arith.subf %84, %87 : vector<1x8x8xf32>
    %89 = math.exp %88 : vector<1x8x8xf32>
    %cst_29 = arith.constant dense<0.000000e+00> : vector<1x8xf32>
    %90 = vector.multi_reduction <add>, %89, %cst_29 [2] : vector<1x8x8xf32> to vector<1x8xf32>
    %91 = vector.shape_cast %90 : vector<1x8xf32> to vector<1x8x1xf32>
    %92 = vector.broadcast %91 : vector<1x8x1xf32> to vector<1x8x8xf32>
    %93 = arith.divf %89, %92 : vector<1x8x8xf32>
    "tpu.trace_start"() <{level = 10 : i32, message = "bqk,bkd->bqd"}> : () -> ()
    %cst_30 = arith.constant dense<0.000000e+00> : vector<1x8x8xf32>
    %94 = tpu.matmul %93, %81, %cst_30 {dimension_numbers = #tpu.dot_dimension_numbers<[2], [1], [1], [2], [0, 0, 0, 1, 1, 2], [0], [0]>} : vector<1x8x8xf32>, vector<1x8x8xf32>, vector<1x8x8xf32> -> vector<1x8x8xf32>
    "tpu.trace_stop"() : () -> ()
    %95 = tpu.concatenate %46, %62, %78, %94 in 2 : vector<1x8x8xf32>, vector<1x8x8xf32>, vector<1x8x8xf32>, vector<1x8x8xf32> -> vector<1x8x32xf32>
    %96 = vector.shape_cast %95 : vector<1x8x32xf32> to vector<8x32xf32>
    %97 = arith.truncf %96 : vector<8x32xf32> to vector<8x32xbf16>
    %c0_31 = arith.constant 0 : index
    %c0_32 = arith.constant 0 : index
    %c0_33 = arith.constant 0 : index
    %98 = vector.load %arg5[%c0_31, %c0_32, %c0_33] : memref<1x32x32xbf16, #tpu.memory_space<vmem>>, vector<1x32x32xbf16>
    %99 = vector.shape_cast %98 : vector<1x32x32xbf16> to vector<32x32xbf16>
    %cst_34 = arith.constant dense<0.000000e+00> : vector<8x32xf32>
    %100 = tpu.matmul %97, %99, %cst_34 {dimension_numbers = #tpu.dot_dimension_numbers<[1], [0], [0], [1], [0, 0, 1, 1], [], []>} : vector<8x32xbf16>, vector<32x32xbf16>, vector<8x32xf32> -> vector<8x32xf32>
    %101 = vector.broadcast %9 : vector<1x32xf32> to vector<8x32xf32>
    %102 = arith.addf %100, %101 : vector<8x32xf32>
    %103 = arith.addf %102, %3 : vector<8x32xf32>
    %cst_35 = arith.constant dense<0.000000e+00> : vector<8xf32>
    %104 = vector.multi_reduction <add>, %103, %cst_35 [1] : vector<8x32xf32> to vector<8xf32>
    %105 = vector.shape_cast %104 : vector<8xf32> to vector<8x1xf32>
    %cst_36 = arith.constant 3.200000e+01 : f32
    %106 = vector.broadcast %cst_36 : f32 to vector<8x1xf32>
    %107 = arith.divf %105, %106 : vector<8x1xf32>
    %108 = vector.broadcast %107 : vector<8x1xf32> to vector<8x32xf32>
    %109 = arith.subf %103, %108 : vector<8x32xf32>
    %110 = arith.mulf %109, %109 : vector<8x32xf32>
    %cst_37 = arith.constant dense<0.000000e+00> : vector<8xf32>
    %111 = vector.multi_reduction <add>, %110, %cst_37 [1] : vector<8x32xf32> to vector<8xf32>
    %112 = vector.shape_cast %111 : vector<8xf32> to vector<8x1xf32>
    %cst_38 = arith.constant 3.200000e+01 : f32
    %113 = vector.broadcast %cst_38 : f32 to vector<8x1xf32>
    %114 = arith.divf %112, %113 : vector<8x1xf32>
    %115 = vector.broadcast %107 : vector<8x1xf32> to vector<8x32xf32>
    %116 = arith.subf %103, %115 : vector<8x32xf32>
    %cst_39 = arith.constant 9.99999974E-6 : f32
    %117 = vector.broadcast %cst_39 : f32 to vector<8x1xf32>
    %118 = arith.addf %114, %117 : vector<8x1xf32>
    %119 = math.rsqrt %118 : vector<8x1xf32>
    %120 = vector.broadcast %119 : vector<8x1xf32> to vector<8x32xf32>
    %121 = arith.mulf %116, %120 : vector<8x32xf32>
    %122 = vector.broadcast %10 : vector<1x32xf32> to vector<8x32xf32>
    %123 = arith.mulf %121, %122 : vector<8x32xf32>
    %124 = vector.broadcast %11 : vector<1x32xf32> to vector<8x32xf32>
    %125 = arith.addf %123, %124 : vector<8x32xf32>
    %126 = arith.truncf %125 : vector<8x32xf32> to vector<8x32xbf16>
    %c0_40 = arith.constant 0 : index
    %c0_41 = arith.constant 0 : index
    %c0_42 = arith.constant 0 : index
    %127 = vector.load %arg6[%c0_40, %c0_41, %c0_42] : memref<1x32x128xbf16, #tpu.memory_space<vmem>>, vector<1x32x128xbf16>
    %128 = vector.shape_cast %127 : vector<1x32x128xbf16> to vector<32x128xbf16>
    %cst_43 = arith.constant dense<0.000000e+00> : vector<8x128xf32>
    %129 = tpu.matmul %126, %128, %cst_43 {dimension_numbers = #tpu.dot_dimension_numbers<[1], [0], [0], [1], [0, 0, 1, 1], [], []>} : vector<8x32xbf16>, vector<32x128xbf16>, vector<8x128xf32> -> vector<8x128xf32>
    %130 = vector.broadcast %14 : vector<1x128xf32> to vector<8x128xf32>
    %131 = arith.addf %129, %130 : vector<8x128xf32>
    %cst_44 = arith.constant 0.000000e+00 : f32
    %132 = vector.broadcast %cst_44 : f32 to vector<8x128xf32>
    %133 = arith.maximumf %131, %132 : vector<8x128xf32>
    %134 = arith.truncf %133 : vector<8x128xf32> to vector<8x128xbf16>
    %c0_45 = arith.constant 0 : index
    %c0_46 = arith.constant 0 : index
    %c0_47 = arith.constant 0 : index
    %135 = vector.load %arg7[%c0_45, %c0_46, %c0_47] : memref<1x128x32xbf16, #tpu.memory_space<vmem>>, vector<1x128x32xbf16>
    %136 = vector.shape_cast %135 : vector<1x128x32xbf16> to vector<128x32xbf16>
    %cst_48 = arith.constant dense<0.000000e+00> : vector<8x32xf32>
    %137 = tpu.matmul %134, %136, %cst_48 {dimension_numbers = #tpu.dot_dimension_numbers<[1], [0], [0], [1], [0, 0, 1, 1], [], []>} : vector<8x128xbf16>, vector<128x32xbf16>, vector<8x32xf32> -> vector<8x32xf32>
    %138 = vector.broadcast %12 : vector<1x32xf32> to vector<8x32xf32>
    %139 = arith.addf %137, %138 : vector<8x32xf32>
    %cst_49 = arith.constant dense<0.000000e+00> : vector<8xf32>
    %140 = vector.multi_reduction <add>, %139, %cst_49 [1] : vector<8x32xf32> to vector<8xf32>
    %141 = vector.shape_cast %140 : vector<8xf32> to vector<8x1xf32>
    %cst_50 = arith.constant 3.200000e+01 : f32
    %142 = vector.broadcast %cst_50 : f32 to vector<8x1xf32>
    %143 = arith.divf %141, %142 : vector<8x1xf32>
    %144 = vector.broadcast %143 : vector<8x1xf32> to vector<8x32xf32>
    %145 = arith.subf %139, %144 : vector<8x32xf32>
    %146 = arith.mulf %145, %145 : vector<8x32xf32>
    %cst_51 = arith.constant dense<0.000000e+00> : vector<8xf32>
    %147 = vector.multi_reduction <add>, %146, %cst_51 [1] : vector<8x32xf32> to vector<8xf32>
    %148 = vector.shape_cast %147 : vector<8xf32> to vector<8x1xf32>
    %cst_52 = arith.constant 3.200000e+01 : f32
    %149 = vector.broadcast %cst_52 : f32 to vector<8x1xf32>
    %150 = arith.divf %148, %149 : vector<8x1xf32>
    %151 = vector.broadcast %143 : vector<8x1xf32> to vector<8x32xf32>
    %152 = arith.subf %139, %151 : vector<8x32xf32>
    %cst_53 = arith.constant 9.99999974E-6 : f32
    %153 = vector.broadcast %cst_53 : f32 to vector<8x1xf32>
    %154 = arith.addf %150, %153 : vector<8x1xf32>
    %155 = math.rsqrt %154 : vector<8x1xf32>
    %156 = vector.broadcast %155 : vector<8x1xf32> to vector<8x32xf32>
    %157 = arith.mulf %152, %156 : vector<8x32xf32>
    %158 = vector.broadcast %10 : vector<1x32xf32> to vector<8x32xf32>
    %159 = arith.mulf %157, %158 : vector<8x32xf32>
    %160 = vector.broadcast %11 : vector<1x32xf32> to vector<8x32xf32>
    %161 = arith.addf %159, %160 : vector<8x32xf32>
    %c0_54 = arith.constant 0 : index
    %c0_55 = arith.constant 0 : index
    %162 = vector.load %arg11[%c0_54, %c0_55] : memref<8x32xf32, #tpu.memory_space<vmem>>, vector<8x32xf32>
    tpu.vector_store %arg11[%c0_54, %c0_55], %161 {strides = array<i32>} : memref<8x32xf32, #tpu.memory_space<vmem>>, vector<8x32xf32>,
    %c1_i32 = arith.constant 1 : i32
    %163 = arith.cmpi eq, %arg1, %c1_i32 : i32
    %164 = arith.extui %163 : i1 to i32
    %c0_i32_56 = arith.constant 0 : i32
    %165 = arith.cmpi ne, %164, %c0_i32_56 : i32
    scf.if %165 {
      %c0_57 = arith.constant 0 : index
      %c0_58 = arith.constant 0 : index
      %166 = vector.load %arg10[%c0_57, %c0_58] : memref<8x32xf32, #tpu.memory_space<vmem>>, vector<8x32xf32>
      tpu.vector_store %arg10[%c0_57, %c0_58], %161 {strides = array<i32>} : memref<8x32xf32, #tpu.memory_space<vmem>>, vector<8x32xf32>,
    } else {
    }
    return
  }
  func.func @transform_0(%arg0: i32, %arg1: i32) -> (i32, i32) {
    %c0_i32 = arith.constant 0 : i32
    %c0_i32_0 = arith.constant 0 : i32
    return %arg0, %c0_i32 : i32, i32
  }
  func.func @transform_1(%arg0: i32, %arg1: i32) -> (i32, i32) {
    %c0_i32 = arith.constant 0 : i32
    %c0_i32_0 = arith.constant 0 : i32
    %c0_i32_1 = arith.constant 0 : i32
    return %c0_i32, %c0_i32_0 : i32, i32
  }
  func.func @transform_2(%arg0: i32, %arg1: i32) -> (i32, i32, i32) {
    %c0_i32 = arith.constant 0 : i32
    %c0_i32_0 = arith.constant 0 : i32
    %c0_i32_1 = arith.constant 0 : i32
    return %arg1, %c0_i32, %c0_i32_0 : i32, i32, i32
  }
  func.func @transform_3(%arg0: i32, %arg1: i32) -> (i32, i32, i32) {
    %c0_i32 = arith.constant 0 : i32
    %c0_i32_0 = arith.constant 0 : i32
    %c0_i32_1 = arith.constant 0 : i32
    return %arg1, %c0_i32, %c0_i32_0 : i32, i32, i32
  }
  func.func @transform_4(%arg0: i32, %arg1: i32) -> (i32, i32, i32) {
    %c0_i32 = arith.constant 0 : i32
    %c0_i32_0 = arith.constant 0 : i32
    %c0_i32_1 = arith.constant 0 : i32
    return %arg1, %c0_i32, %c0_i32_0 : i32, i32, i32
  }
  func.func @transform_5(%arg0: i32, %arg1: i32) -> (i32, i32, i32) {
    %c0_i32 = arith.constant 0 : i32
    %c0_i32_0 = arith.constant 0 : i32
    %c0_i32_1 = arith.constant 0 : i32
    return %arg1, %c0_i32, %c0_i32_0 : i32, i32, i32
  }
  func.func @transform_6(%arg0: i32, %arg1: i32) -> (i32, i32, i32) {
    %c0_i32 = arith.constant 0 : i32
    %c0_i32_0 = arith.constant 0 : i32
    %c0_i32_1 = arith.constant 0 : i32
    return %arg1, %c0_i32, %c0_i32_0 : i32, i32, i32
  }
  func.func @transform_7(%arg0: i32, %arg1: i32) -> (i32, i32, i32) {
    %c0_i32 = arith.constant 0 : i32
    %c0_i32_0 = arith.constant 0 : i32
    %c0_i32_1 = arith.constant 0 : i32
    return %arg1, %c0_i32, %c0_i32_0 : i32, i32, i32
  }
  func.func @transform_8(%arg0: i32, %arg1: i32) -> (i32, i32) {
    %c0_i32 = arith.constant 0 : i32
    %c0_i32_0 = arith.constant 0 : i32
    return %arg0, %c0_i32 : i32, i32
  }
}

</mosaic_0001>

<bundles_post_ra>
// kernel: encoder_forward.1
= control target key start
LH: loop header
LB: loop body
LE: loop exit
PB: predicated region body
PF: predicated region fallthrough
CT: control target
= control target key end

     0   :  { %s1809_s0 = inlined_call_operand.vmem [shape: f32[16,32], index: 0, kind: input, shape index: {}]   ;;  %s1810_s1 = inlined_call_operand.vmem [shape: f32[8,32], index: 1, kind: input, shape index: {}]   ;;  %s1811_s2 = inlined_call_operand.vmem [shape: bf16[2,32,96], index: 2, kind: input, shape index: {}]   ;;  %s1812_s3 = inlined_call_operand.vmem [shape: bf16[2,32,32], index: 3, kind: input, shape index: {}]   ;;  %s1813_s4 = inlined_call_operand.vmem [shape: bf16[2,32,128], index: 4, kind: input, shape index: {}]   ;;  %s1814_s5 = inlined_call_operand.vmem [shape: bf16[2,128,32], index: 5, kind: input, shape index: {}]   ;;  %s1815_s6 = inlined_call_operand.vmem [shape: f32[2,8,32], index: 6, kind: input, shape index: {}]   ;;  %s1816_s7 = inlined_call_operand.vmem [shape: f32[2,1,128], index: 7, kind: input, shape index: {}]   ;;  %s1817_s8 = inlined_call_operand.hbm [shape: f32[16,32], index: 8, kind: output, shape index: {}]  }
   0x1   :  { %1828 = sst [smem:[#allocation15_spill]] %s1809_s0 }
   0x2   :  { %1829 = sst [smem:[#allocation16_spill]] %s1811_s2 }
   0x3   :  { %1830 = sst [smem:[#allocation17_spill]] %s1817_s8 }
   0x4   :  { %13 = vsyncpa [#allocation4], 0 }
   0x5   :  { %15 = vsyncpa [#allocation4 + $0x1], 0  ;;  %s1568_s27 = smov 0   ;;  %s1570_s28 = smov 0  }
   0x6   :  { %s1572_s29 = smov 0   ;;  %s1574_s30 = smov 0  }
   0x7   :  { %s1576_s9 = smov 0   ;;  %s1578_s10 = smov 0  }
   0x8   :  { %s1580_s11 = smov 0   ;;  %s1582_s12 = smov 0  }
   0x9 LB: > { %1831 = sst [smem:[#allocation6_spill]] %s1477_s27  ;;  %s1190_s13 = sadd.s32 4294967295, %s1505_s12   ;;  %s1505_s12 = sphi %s1582_s12, %s21_s12   ;;  %s1501_s11 = sphi %s1580_s11, %s1854_s11   ;;  %s1497_s10 = sphi %s1578_s10, %s1853_s10   ;;  %s1493_s9 = sphi %s1576_s9, %s1852_s9   ;;  %s1489_s30 = sphi %s1574_s30, %s1851_s30   ;;  %s1485_s29 = sphi %s1572_s29, %s1850_s29   ;;  %s1481_s28 = sphi %s1570_s28, %s1856_s28   ;;  %s1477_s27 = sphi %s1568_s27, %s1855_s27  }
   0xa   : > { %1832 = sst [smem:[#allocation7_spill]] %s1485_s29  ;;  %s1191_s14 = sadd.s32 4294967294, %s1505_s12  }
   0xb   : > { %1833 = sst [smem:[#allocation8_spill]] %s1497_s10  ;;  %s30_s15 = sadd.s32 1, %s1497_s10 }
   0xc   : > { %1834 = sst [smem:[#allocation9_spill]] %s1501_s11  ;;  %p31_p0 = scmp.ge.s32.totalorder %s30_s15, 2 }
   0xd   : > { %1835 = sst [smem:[#allocation10_spill]] %s1505_s12  ;;  %s33_s16 = sadd.s32 1, %s1501_s11 }
   0xe   : > { %p253_p1 = scmp.ne.s32.totalorder %s1485_s29, %s1481_s28  ;;  %p254_p2 = scmp.eq.s32.totalorder %s1190_s13, 3 }
   0xf   : > { %s1858_s15 = smov (%p31_p0, %s30_s15), 0  ;;  %s1860_s16 = smov (!%p31_p0, %s33_s16), %s1501_s11 }
  0x10   : > { %1836 = sst [smem:[#allocation11_spill]] %s1858_s15  ;;  %p1617_p3 = por %p254_p2, %p253_p1 }
  0x11   : > { %p259_p4 = scmp.ne.s32.totalorder %s1481_s28, %s1477_s27  ;;  %p35_p5 = scmp.ge.s32.totalorder %s1860_s16, 2 }
  0x12   : > { %p260_p6 = scmp.eq.s32.totalorder %s1191_s14, 3  ;;  %p1194_p7 = scmp.ge.s32.totalorder %s1505_s12, 1 }
  0x13   : > { %p333_p8 = scmp.lt.s32.totalorder %s1505_s12, 5  ;;  %s1862_s16 = smov (%p35_p5, %s1860_s16), 0 }
  0x14   : > { %1838 = sst [smem:[#allocation12_spill]] %s1862_s16  ;;  %p1627_p9 = por %p260_p6, %p259_p4 }
  0x15   : > { %p334_p10 = pnand %p1194_p7, %p333_p8  ;;  %s240_s19 = ssub.s32 %s1501_s11, %s1862_s16 }
  0x16   : > { %s1839_s18 = scalar_select %p1627_p9, 1, 0 }
  0x17   : > { %s243_s20 = sadd.s32 1, %s1485_s29  ;;  %p241_p11 = scmp.eq.s32.totalorder %s240_s19, 0 }
  0x18   : > { %1840 = sst [smem:[#allocation13_spill]] %s1839_s18  ;;  %337 = sbr.rel (%p334_p10) target bundleno = 2315 (0x90b), region = 52 }
  0x19   : > { %s1635_s21 = scalar_select %p241_p11, %s1485_s29, %s243_s20  }
  0x1a   : > { %s1819_s22 = sand.u32 (!%p334_p10), 1, %s1481_s28   ;;  %p393_p12 = scmp.lt.s32.totalorder (!%p334_p10), %s1493_s9, 1 }
  0x1b   : > { %1841 = sst [smem:[#allocation14_spill]] %s1635_s21  ;;  %s1641_s23 = sshll.u32 (!%p334_p10), %s1819_s22, 3 }
  0x1c   : > { %p397_p13 = scmp.lt.s32.totalorder (!%p334_p10), %s1489_s30, 1  ;;  %s1842_s0 = sld [smem:[#allocation15_spill]] (!%p334_p10) }
  0x1d   : > { %s394_s24 = scalar_select %p393_p12, %s1493_s9, 1 }
  0x1e   : > { %s1646_s25 = scalar_select %p397_p13, %s1489_s30, 1 }
  0x1f   : > { %s1196_s26 = sshll.u32 %s394_s24, 3  ;;  %s1843_s2 = sld [smem:[#allocation16_spill]] }
  0x20   : > { %s1283_s20 = sshll.u32 %s1646_s25, 4  ;;  %s1286_s24 = sshll.u32 %s1646_s25, 6 }
  0x21   : > { %s1658_s21 = scalar_lea.vmem %s1812_s3, %s1283_s20  ;;  %s1663_s27 = scalar_lea.vmem %s1813_s4, %s1283_s20 }
  0x22   : > { %s396_s19 = scalar_lea.vmem %s1842_s0, %s1196_s26  ;;  %s1669_s26 = scalar_lea.vmem %s1814_s5, %s1286_s24 }
  0x23   : > { %s1205_s13 = sshll.u32 %s1646_s25, 3  ;;  %s423_s11 = scalar_lea.vmem %s1816_s7, %s1646_s25 }
  0x24   : > { %s420_s16 = scalar_lea.vmem %s1815_s6, %s1205_s13  ;;  %p1206_p0 = scmp.ne.s32.totalorder %s1489_s30, 0 }
  0x25   : > { %s401_s22 = scalar_lea.vmem %s1843_s2, %s1283_s20  ;;  %s392_s2 = scalar_lea.vmem [#allocation3], %s1641_s23 }
  0x26   : > { %428 = sbr.rel (%p1206_p0) target bundleno = 49 (0x31), region = 56 }
  0x2b   : > { %v429_v0 = vld [vmem:[%s396_s19] sm:$0xff]  ;;  %vm433_vm0 = vcmask 261120  }
  0x2c   : > { %v431_v1 = vld [vmem:[%s1810_s1] sm:$0xff]  ;;  %v430_v2 = vmul.f32 5.656854, %v429_v0 }
  0x2e   : > { %v432_v3 = vadd.f32 %v431_v1, %v430_v2 }
  0x30   : > { %434 = vst.msk [vmem:[#allocation2] sm:$0xff] %vm433_vm0, %v432_v3 }
  0x31 PF: > { %v1288_v4 = vld [vmem:[%s401_s22 + $0x8] sm:$0xff]  ;;  %v1684_v5 = vld [vmem:[%s420_s16] sm:$0xff]  ;;  %s1507_s0 = smov 32   ;;  %vm455_vm1 = vcmask 261120   ;;  %s1508_s8 = smov 88   ;;  %vm489_vm2 = vcmask 64512  }
  0x32   : > { %465 = vmatpush.bf16.msra.mxu0 %v1288_v4  ;;  %v1287_v6 = vld [vmem:[%s401_s22] sm:$0xff]  ;;  %v474_v8 = vperm.slane %v1684_v5, 1  ;;  %s1509_s12 = smov 96   ;;  %v472_v13 = vperm.slane %v1684_v5, 0  ;;  %s1510_s22 = smov 120   ;;  %v480_v22 = vperm.slane %v1684_v5, 2 }
  0x33   : > { %s1511_s19 = smov 64   ;;  %s1512_s20 = smov 72  }
  0x34   : > { %476 = vrot.lane.b32.xlu0 %v474_v8, %s1507_s0  ;;  %s1513_s24 = smov 80   ;;  %s1514_s13 = smov 112  }
  0x35   : > { %s1515_s14 = smov 104   ;;  %s1516_s15 = smov 56  }
  0x36   : > { %466 = vmatpush.bf16.msra.mxu0 %v1287_v6  ;;  %s1517_s16 = smov 48   ;;  %s1518_s10 = smov 40  }
  0x37   : > { %v1686_v7 = vld [vmem:[#allocation2] sm:$0xff]  ;;  %s1519_s29 = smov 8   ;;  %s1520_s18 = smov 24  }
  0x38   : > { %v438_v9 = vpack.c.bf16 %v1686_v7, %v1686_v7  ;;  %s1521_s0 = smov 16   ;;  %p1278_p1 = scmp.ne.s32.totalorder %s1489_s30, 1 }
  0x3a   : > { %1215 = vmatmul.msk.bf16.vlgmr.msra.gmra.mxu0 %vm455_vm1, %v438_v9 }
  0xa6   : > { %v477_v10 = vpop.permute.xlu0 %476 }
  0xb7   : > { %v468_v11 = vpop.f32.mrf.mxu0 }
  0xb8   : > { %v479_v12 = vadd.f32 %v477_v10, %v468_v11  ;;  %v473_v15 = vadd.f32 %v472_v13, %v468_v11 }
  0xba   : > { %569 = vrot.lane.b32.xlu2 %v479_v12, %s1508_s8  ;;  %487 = vrot.lane.b32.xlu0 %v479_v12, %s1509_s12 }
  0xbf   : > { %v470_v14 = vpop.f32.mrf.mxu0 }
  0xc2   : > { %567 = vrot.lane.b32.xlu0 %v473_v15, %s1510_s22 }
 0x114   : > { %v570_v16 = vpop.permute.xlu2 %569 }
 0x115   : > { %1219 = vmatpush.xpose.msk.msra.mxu3 %vm489_vm2, %v570_v16 }
 0x12c   : > { %v488_v17 = vpop.permute.xlu0 %487 }
 0x12d   : > { %1216 = vmatpush.xpose.msk.msra.mxu1 %vm489_vm2, %v488_v17 }
 0x130   : > { %1217 = vmatmul.msk.f32.vlgmr.msra.gmra.mxu1 %vm489_vm2, %v473_v15 }
 0x134   : > { %v568_v18 = vpop.permute.xlu0 %567 }
 0x135   : > { %1220 = vmatmul.msk.f32.vlgmr.msra.gmra.mxu3 %vm489_vm2, %v568_v18 }
 0x1ad   : > { %v512_v19 = vpop.f32.mrf.mxu1 }
 0x1ae   : > { %v515_v20 = vmul.f32 0.35355338, %v512_v19 }
 0x1b0   : > { %v516_v21 = vsel %vm489_vm2, %v515_v20, -inf }
 0x1b1   : > { %517 = vmax.xlane.f32.xlu1 %v516_v21 }
 0x1b8   : > { %v592_v30 = vpop.f32.mrf.mxu3 }
 0x1b9   : > { %v595_v31 = vmul.f32 0.35355338, %v592_v30 }
 0x1bb   : > { %v596_v32 = vsel %vm489_vm2, %v595_v31, -inf }
 0x1ca   : > { %482 = vrot.lane.b32.xlu1 %v480_v22, %s1511_s19 }
 0x1d2   : > { %727 = vrot.lane.b32.xlu1 %v479_v12, %s1512_s20 }
 0x224   : > { %v518_v23 = vpop.xlane.xlu1 %517 }
 0x225   : > { %v519_v24 = vsub.f32 %v515_v20, %v518_v23 }
 0x227   : > { %v520_v25 = vmul.f32 1.442695, %v519_v24 }
 0x229   : > { %1389 = vpow2.f32 %v520_v25 }
 0x22f   : > { %v1390_v26 = vpop.eup %1389 }
 0x230   : > { %v522_v27 = vsel %vm489_vm2, %v1390_v26, 0.0 }
 0x231   : > { %523 = vadd.xlane.f32.xlu2 %v522_v27 }
 0x23c   : > { %v483_v28 = vpop.permute.xlu1 %482 }
 0x23d   : > { %v1700_v29 = vadd.f32 %v483_v28, %v468_v11 }
 0x23f   : > { %541 = vrot.lane.b32.xlu0 %v1700_v29, %s1511_s19 }
 0x244   : > { %v728_v47 = vpop.permute.xlu1 %727 }
 0x247   : > { %648 = vrot.lane.b32.xlu0 %v479_v12, %s1513_s24 }
 0x249   : > { %646 = vrot.lane.b32.xlu2 %v473_v15, %s1514_s13 }
 0x24f   : > { %725 = vrot.lane.b32.xlu0 %v473_v15, %s1515_s14 }
 0x272   : > { %597 = vmax.xlane.f32.xlu2 %v596_v32 }
 0x2a4   : > { %v524_v33 = vpop.xlane.xlu2 %523 }
 0x2a5   : > { %1391 = vrcp.f32 %v524_v33  ;;  %v536_v37 = vand.u32 2147483648, %v524_v33  ;;  %v534_v39 = vand.u32 2147483647, %v524_v33  ;;  %vm530_vm4 = vweird.f32 %v524_v33 }
 0x2a7   : > { %v537_v42 = vor.u32 1.1754944e-38, %v536_v37  ;;  %vm535_vm6 = vcmp.eq.f32.partialorder %v534_v39, 8.507059e+37 }
 0x2ab   : > { %v1392_v34 = vpop.eup %1391 }
 0x2ac   : > { %v526_v35 = vmul.f32 %v1392_v34, %v524_v33  ;;  %vm531_vm3 = vweird.f32 %v1392_v34  ;;  %v647_v48 = vpop.permute.xlu2 %646 }
 0x2ad   : > { %vm532_vm5 = vmor %vm530_vm4, %vm531_vm3 }
 0x2ae   : > { %v527_v36 = vsub.f32 1.0, %v526_v35 }
 0x2b0   : > { %v528_v38 = vmul.f32 %v1392_v34, %v527_v36 }
 0x2b1   : > { %v542_v40 = vpop.permute.xlu0 %541 }
 0x2b2   : > { %v529_v41 = vadd.f32 %v1392_v34, %v528_v38  ;;  %562 = vmatpush.msrb.mxu1 %v542_v40 }
 0x2b4   : > { %v533_v43 = vsel %vm532_vm5, %v1392_v34, %v529_v41  ;;  %vm817_vm5 = vcmask 130048  }
 0x2b5   : > { %v538_v44 = vsel %vm535_vm6, %v537_v42, %v533_v43  ;;  %vm819_vm6 = vcmask 195584  }
 0x2b6   : > { %v539_v45 = vmul.f32 %v1390_v26, %v538_v44 }
 0x2b8   : > { %1218 = vmatmul.msk.f32.vlgmr.msrb.gmra.mxu1 %vm489_vm2, %v539_v45 }
 0x2b9   : > { %v649_v46 = vpop.permute.xlu0 %648 }
 0x2ba   : > { %1222 = vmatpush.xpose.msk.msra.mxu1 %vm489_vm2, %v649_v46 }
 0x2be   : > { %1225 = vmatpush.xpose.msk.msrb.mxu1 %vm489_vm2, %v728_v47 }
 0x2c0   : > { %1223 = vmatmul.msk.f32.vlgmr.msra.gmra.mxu1 %vm489_vm2, %v647_v48 }
 0x2c1   : > { %v726_v49 = vpop.permute.xlu0 %725 }
 0x2c8   : > { %1226 = vmatmul.msk.f32.vlgmr.msrb.gmra.mxu1 %vm489_vm2, %v726_v49 }
 0x2e5   : > { %v598_v50 = vpop.xlane.xlu2 %597 }
 0x2e6   : > { %v599_v51 = vsub.f32 %v595_v31, %v598_v50 }
 0x2e8   : > { %v600_v52 = vmul.f32 1.442695, %v599_v51 }
 0x2ea   : > { %1393 = vpow2.f32 %v600_v52  ;;  %v1290_v52 = vld [vmem:[%s1658_s21 + $0x8] sm:$0xff] }
 0x2f0   : > { %v1394_v53 = vpop.eup %1393 }
 0x2f1   : > { %v602_v54 = vsel %vm489_vm2, %v1394_v53, 0.0 }
 0x2f2   : > { %603 = vadd.xlane.f32.xlu2 %v602_v54 }
 0x335   : > { %v1710_v55 = vpop.f32.mrf.mxu1 }
 0x33d   : > { %v671_v56 = vpop.f32.mrf.mxu1 }
 0x33e   : > { %v674_v57 = vmul.f32 0.35355338, %v671_v56 }
 0x340   : > { %v675_v58 = vsel %vm489_vm2, %v674_v57, -inf }
 0x341   : > { %676 = vmax.xlane.f32.xlu1 %v675_v58 }
 0x345   : > { %v750_v59 = vpop.f32.mrf.mxu1 }
 0x346   : > { %v753_v60 = vmul.f32 0.35355338, %v750_v59 }
 0x348   : > { %v754_v61 = vsel %vm489_vm2, %v753_v60, -inf }
 0x349   : > { %755 = vmax.xlane.f32.xlu0 %v754_v61 }
 0x35d   : > { %620 = vrot.lane.b32.xlu0 %v1700_v29, %s1516_s15 }
 0x365   : > { %v604_v62 = vpop.xlane.xlu2 %603 }
 0x366   : > { %1395 = vrcp.f32 %v604_v62  ;;  %v616_v14 = vand.u32 2147483648, %v604_v62  ;;  %vm610_vm8 = vweird.f32 %v604_v62  ;;  %v614_v16 = vand.u32 2147483647, %v604_v62 }
 0x368   : > { %v617_v19 = vor.u32 1.1754944e-38, %v616_v14  ;;  %vm615_vm10 = vcmp.eq.f32.partialorder %v614_v16, 8.507059e+37  ;;  %v1292_v16 = vld [vmem:[%s1663_s27 + $0x8] sm:$0xff] }
 0x369   : > { %918 = vmatpush.bf16.msrb.mxu0 %v1292_v16 }
 0x36c   : > { %v1396_v1 = vpop.eup %1395 }
 0x36d   : > { %v606_v3 = vmul.f32 %v1396_v1, %v604_v62  ;;  %vm611_vm7 = vweird.f32 %v1396_v1  ;;  %v826_v62 = vperm.slane %v1684_v5, 3 }
 0x36e   : > { %vm612_vm9 = vmor %vm610_vm8, %vm611_vm7 }
 0x36f   : > { %v607_v6 = vsub.f32 1.0, %v606_v3 }
 0x371   : > { %v608_v12 = vmul.f32 %v1396_v1, %v607_v6 }
 0x373   : > { %v609_v13 = vadd.f32 %v1396_v1, %v608_v12 }
 0x375   : > { %v613_v18 = vsel %vm612_vm9, %v1396_v1, %v609_v13 }
 0x376   : > { %v618_v20 = vsel %vm615_vm10, %v617_v19, %v613_v18  ;;  %v1300_v18 = vld [vmem:[%s1669_s26 + $0x38] sm:$0xff] }
 0x377   : > { %v619_v22 = vmul.f32 %v1394_v53, %v618_v20  ;;  %v1289_v53 = vld [vmem:[%s1658_s21] sm:$0xff]  ;;  %992 = vmatpush.bf16.msra.mxu2 %v1300_v18 }
 0x3b4   : > { %v677_v63 = vpop.xlane.xlu1 %676 }
 0x3b5   : > { %v678_v0 = vsub.f32 %v674_v57, %v677_v63 }
 0x3b7   : > { %v679_v2 = vmul.f32 1.442695, %v678_v0 }
 0x3b9   : > { %1397 = vpow2.f32 %v679_v2 }
 0x3bc   : > { %v756_v4 = vpop.xlane.xlu0 %755 }
 0x3bd   : > { %v757_v8 = vsub.f32 %v753_v60, %v756_v4  ;;  %v1522_v4 = vmov 32.0  }
 0x3bf   : > { %v1398_v9 = vpop.eup %1397  ;;  %v758_v10 = vmul.f32 1.442695, %v757_v8 }
 0x3c0   : > { %v681_v11 = vsel %vm489_vm2, %v1398_v9, 0.0 }
 0x3c1   : > { %1399 = vpow2.f32 %v758_v10  ;;  %682 = vadd.xlane.f32.xlu1 %v681_v11 }
 0x3c7   : > { %v1400_v15 = vpop.eup %1399 }
 0x3c8   : > { %v760_v17 = vsel %vm489_vm2, %v1400_v15, 0.0 }
 0x3c9   : > { %761 = vadd.xlane.f32.xlu2 %v760_v17  ;;  %v1291_v17 = vld [vmem:[%s1663_s27] sm:$0xff] }
 0x3ca   : > { %919 = vmatpush.bf16.msrb.mxu0 %v1291_v17 }
 0x3cf   : > { %v621_v21 = vpop.permute.xlu0 %620 }
 0x3d0   : > { %641 = vmatpush.msrb.mxu3 %v621_v21  ;;  %v1299_v21 = vld [vmem:[%s1669_s26 + $0x30] sm:$0xff] }
 0x3d1   : > { %1221 = vmatmul.msk.f32.vlgmr.msrb.gmra.mxu3 %vm489_vm2, %v619_v22  ;;  %993 = vmatpush.bf16.msra.mxu2 %v1299_v21 }
 0x3da   : > { %699 = vrot.lane.b32.xlu1 %v1700_v29, %s1517_s16 }
 0x3e1   : > { %778 = vrot.lane.b32.xlu2 %v1700_v29, %s1518_s10 }
 0x434   : > { %v683_v23 = vpop.xlane.xlu1 %682 }
 0x435   : > { %1401 = vrcp.f32 %v683_v23  ;;  %v695_v32 = vand.u32 2147483648, %v683_v23  ;;  %vm689_vm12 = vweird.f32 %v683_v23  ;;  %v693_v33 = vand.u32 2147483647, %v683_v23 }
 0x437   : > { %v696_v37 = vor.u32 1.1754944e-38, %v695_v32  ;;  %vm694_vm14 = vcmp.eq.f32.partialorder %v693_v33, 8.507059e+37 }
 0x43b   : > { %v1402_v24 = vpop.eup %1401 }
 0x43c   : > { %v685_v25 = vmul.f32 %v1402_v24, %v683_v23  ;;  %v762_v26 = vpop.xlane.xlu2 %761  ;;  %vm690_vm11 = vweird.f32 %v1402_v24  ;;  %v1298_v23 = vld [vmem:[%s1669_s26 + $0x28] sm:$0xff] }
 0x43d   : > { %1403 = vrcp.f32 %v762_v26  ;;  %vm691_vm13 = vmor %vm689_vm12, %vm690_vm11  ;;  %v774_v38 = vand.u32 2147483648, %v762_v26  ;;  %v772_v40 = vand.u32 2147483647, %v762_v26  ;;  %vm768_vm0 = vweird.f32 %v762_v26  ;;  %994 = vmatpush.bf16.msra.mxu2 %v1298_v23 }
 0x43e   : > { %v686_v27 = vsub.f32 1.0, %v685_v25  ;;  %1405 = vrcp.f32 %v1522_v4 }
 0x43f   : > { %v775_v43 = vor.u32 1.1754944e-38, %v774_v38  ;;  %vm773_vm4 = vcmp.eq.f32.partialorder %v772_v40, 8.507059e+37  ;;  %v1294_v40 = vld [vmem:[%s1669_s26 + $0x8] sm:$0xff] }
 0x440   : > { %v687_v28 = vmul.f32 %v1402_v24, %v686_v27  ;;  %v1296_v27 = vld [vmem:[%s1669_s26 + $0x18] sm:$0xff] }
 0x442   : > { %v688_v30 = vadd.f32 %v1402_v24, %v687_v28 }
 0x443   : > { %v1404_v31 = vpop.eup %1403 }
 0x444   : > { %v764_v34 = vmul.f32 %v1404_v31, %v762_v26  ;;  %v779_v35 = vpop.permute.xlu2 %778  ;;  %v692_v36 = vsel %vm691_vm13, %v1402_v24, %v688_v30  ;;  %vm769_vm15 = vweird.f32 %v1404_v31  ;;  %v1297_v24 = vld [vmem:[%s1669_s26 + $0x20] sm:$0xff] }
 0x445   : > { %799 = vmatpush.msra.mxu1 %v779_v35  ;;  %v697_v41 = vsel %vm694_vm14, %v696_v37, %v692_v36  ;;  %vm770_vm3 = vmor %vm768_vm0, %vm769_vm15  ;;  %995 = vmatpush.bf16.msra.mxu2 %v1297_v24 }
 0x446   : > { %v765_v29 = vsub.f32 1.0, %v764_v34  ;;  %v698_v46 = vmul.f32 %v1398_v9, %v697_v41  ;;  %v885_v34 = vperm.slane %v1684_v5, 4  ;;  %v1293_v41 = vld [vmem:[%s1669_s26] sm:$0xff] }
 0x448   : > { %v766_v39 = vmul.f32 %v1404_v31, %v765_v29  ;;  %v887_v29 = vperm.slane %v1684_v5, 5 }
 0x449   : > { %996 = vmatpush.bf16.msra.mxu2 %v1296_v27 }
 0x44a   : > { %v767_v42 = vadd.f32 %v1404_v31, %v766_v39 }
 0x44c   : > { %v771_v44 = vsel %vm770_vm3, %v1404_v31, %v767_v42  ;;  %v700_v45 = vpop.permute.xlu1 %699  ;;  %v1295_v31 = vld [vmem:[%s1669_s26 + $0x10] sm:$0xff]  ;;  %v1388_v42 = vld [vmem:[%s423_s11] ss:$0 sm:$0xff] }
 0x44d   : > { %v776_v47 = vsel %vm773_vm4, %v775_v43, %v771_v44  ;;  %720 = vmatpush.msra.mxu3 %v700_v45  ;;  %997 = vmatpush.bf16.msra.mxu2 %v1295_v31 }
 0x44e   : > { %1224 = vmatmul.msk.f32.vlgmr.msra.gmra.mxu3 %vm489_vm2, %v698_v46  ;;  %v777_v48 = vmul.f32 %v1400_v15, %v776_v47 }
 0x44f   : > { %848 = vmatpush.bf16.msrb.mxu3 %v1290_v52 }
 0x450   : > { %1227 = vmatmul.msk.f32.vlgmr.msra.gmra.mxu1 %vm489_vm2, %v777_v48  ;;  %v943_v48 = vperm.slane %v1684_v5, 6 }
 0x451   : > { %998 = vmatpush.bf16.msra.mxu2 %v1294_v40 }
 0x453   : > { %849 = vmatpush.bf16.msrb.mxu3 %v1289_v53 }
 0x454   : > { %v643_v49 = vpop.f32.mrf.mxu3 }
 0x455   : > { %805 = vrot.lane.b32.xlu0 %v643_v49, %s1519_s29  ;;  %999 = vmatpush.bf16.msra.mxu2 %v1293_v41 }
 0x4c7   : > { %v806_v54 = vpop.permute.xlu0 %805 }
 0x4c8   : > { %v816_v56 = vsel %vm489_vm2, %v1710_v55, %v806_v54  ;;  %v1406_v55 = vpop.eup %1405 }
 0x4c9   : > { %v860_v6 = vmul.f32 32.0, %v1406_v55  ;;  %vm864_vm2 = vweird.f32 %v1406_v55 }
 0x4cb   : > { %v861_v8 = vsub.f32 1.0, %v860_v6 }
 0x4cd   : > { %v801_v50 = vpop.f32.mrf.mxu1  ;;  %v862_v9 = vmul.f32 %v1406_v55, %v861_v8 }
 0x4ce   : > { %813 = vrot.lane.b32.xlu0 %v801_v50, %s1520_s18 }
 0x4cf   : > { %v863_v10 = vadd.f32 %v1406_v55, %v862_v9 }
 0x4d1   : > { %v722_v51 = vpop.f32.mrf.mxu3  ;;  %v1730_v11 = vsel %vm864_vm2, %v1406_v55, %v863_v10 }
 0x4d2   : > { %809 = vrot.lane.b32.xlu1 %v722_v51, %s1521_s0 }
 0x540   : > { %v814_v58 = vpop.permute.xlu0 %813 }
 0x544   : > { %v810_v57 = vpop.permute.xlu1 %809 }
 0x545   : > { %v818_v59 = vsel %vm817_vm5, %v816_v56, %v810_v57 }
 0x546   : > { %v820_v60 = vsel %vm819_vm6, %v818_v59, %v814_v58 }
 0x547   : > { %v821_v61 = vpack.c.bf16 %v820_v60, %v820_v60 }
 0x549   : > { %1236 = vmatmul.msk.bf16.vlgmr.msrb.gmra.mxu3 %vm455_vm1, %v821_v61 }
 0x5cc   : > { %v851_v63 = vpop.f32.mrf.mxu3 }
 0x5cd   : > { %v852_v0 = vadd.f32 %v851_v63, %v826_v62 }
 0x5cf   : > { %v855_v1 = vadd.f32 %v852_v0, %v1686_v7 }
 0x5d1   : > { %v856_v2 = vsel %vm455_vm1, %v855_v1, 0.0 }
 0x5d2   : > { %857 = vadd.xlane.f32.xlu2 %v856_v2 }
 0x5d4   : > { %v853_v3 = vpop.f32.mrf.mxu3 }
 0x645   : > { %v858_v12 = vpop.xlane.xlu2 %857 }
 0x646   : > { %v866_v7 = vmul.f32 %v1730_v11, %v858_v12 }
 0x648   : > { %v867_v13 = vsub.f32 %v855_v1, %v866_v7 }
 0x64a   : > { %v868_v14 = vmul.f32 %v867_v13, %v867_v13 }
 0x64c   : > { %v869_v15 = vsel %vm455_vm1, %v868_v14, 0.0 }
 0x64d   : > { %870 = vadd.xlane.f32.xlu1 %v869_v15 }
 0x6c0   : > { %v871_v19 = vpop.xlane.xlu1 %870 }
 0x6c1   : > { %v872_v20 = vmul.f32 %v871_v19, %v1730_v11 }
 0x6c3   : > { %v873_v22 = vadd.f32 1e-05, %v872_v20 }
 0x6c5   : > { %1407 = vrsqrt.f32 %v873_v22  ;;  %vm880_vm8 = vweird.f32 %v873_v22 }
 0x6cb   : > { %v1408_v25 = vpop.eup %1407 }
 0x6cc   : > { %v875_v26 = vmul.f32 %v1408_v25, %v873_v22  ;;  %vm881_vm7 = vweird.f32 %v1408_v25 }
 0x6cd   : > { %vm882_vm9 = vmor %vm880_vm8, %vm881_vm7 }
 0x6ce   : > { %v876_v28 = vmul.f32 %v1408_v25, %v875_v26 }
 0x6d0   : > { %v877_v30 = vmul.f32 0.5, %v876_v28 }
 0x6d2   : > { %v878_v32 = vsub.f32 1.5, %v877_v30 }
 0x6d4   : > { %v879_v33 = vmul.f32 %v1408_v25, %v878_v32 }
 0x6d6   : > { %v883_v35 = vsel %vm882_vm9, %v1408_v25, %v879_v33 }
 0x6d7   : > { %v884_v36 = vmul.f32 %v883_v35, %v867_v13 }
 0x6d9   : > { %v886_v37 = vmul.f32 %v885_v34, %v884_v36 }
 0x6db   : > { %v888_v38 = vadd.f32 %v887_v29, %v886_v37 }
 0x6dd   : > { %v889_v39 = vpack.c.bf16 %v888_v38, %v888_v38 }
 0x6df   : > { %1245 = vmatmul.msk.bf16.vlgmr.msrb.gmra.mxu0 %vm455_vm1, %v889_v39 }
 0x75c   : > { %v921_v43 = vpop.f32.mrf.mxu0 }
 0x75d   : > { %v922_v44 = vadd.f32 %v1388_v42, %v921_v43 }
 0x75f   : > { %v925_v45 = vmax.f32 %v922_v44, 0.0 }
 0x761   : > { %v926_v46 = vpack.c.bf16 %v925_v45, %v925_v45 }
 0x763   : > { %1000 = vmatmul.bf16.vlgmr.msra.gmra.mxu2 %v926_v46 }
 0x764   : > { %v923_v47 = vpop.f32.mrf.mxu0 }
 0x7e6   : > { %v1001_v49 = vpop.f32.mrf.mxu2 }
 0x7e7   : > { %v1002_v50 = vadd.f32 %v1001_v49, %v943_v48 }
 0x7e9   : > { %v1005_v51 = vsel %vm455_vm1, %v1002_v50, 0.0 }
 0x7ea   : > { %1006 = vadd.xlane.f32.xlu0 %v1005_v51 }
 0x7ee   : > { %v1003_v52 = vpop.f32.mrf.mxu2 }
 0x85d   : > { %v1007_v53 = vpop.xlane.xlu0 %1006 }
 0x85e   : > { %v1008_v54 = vmul.f32 %v1007_v53, %v1730_v11 }
 0x860   : > { %v1009_v56 = vsub.f32 %v1002_v50, %v1008_v54 }
 0x862   : > { %v1010_v57 = vmul.f32 %v1009_v56, %v1009_v56 }
 0x864   : > { %v1011_v58 = vsel %vm455_vm1, %v1010_v57, 0.0 }
 0x865   : > { %1012 = vadd.xlane.f32.xlu2 %v1011_v58 }
 0x8d8   : > { %v1013_v59 = vpop.xlane.xlu2 %1012 }
 0x8d9   : > { %v1014_v60 = vmul.f32 %v1013_v59, %v1730_v11 }
 0x8db   : > { %v1015_v61 = vadd.f32 1e-05, %v1014_v60 }
 0x8dd   : > { %1409 = vrsqrt.f32 %v1015_v61  ;;  %vm1022_vm11 = vweird.f32 %v1015_v61 }
 0x8e3   : > { %v1410_v5 = vpop.eup %1409 }
 0x8e4   : > { %v1017_v62 = vmul.f32 %v1410_v5, %v1015_v61  ;;  %vm1023_vm10 = vweird.f32 %v1410_v5 }
 0x8e5   : > { %vm1024_vm12 = vmor %vm1022_vm11, %vm1023_vm10 }
 0x8e6   : > { %v1018_v63 = vmul.f32 %v1410_v5, %v1017_v62 }
 0x8e8   : > { %v1019_v0 = vmul.f32 0.5, %v1018_v63 }
 0x8ea   : > { %v1020_v1 = vsub.f32 1.5, %v1019_v0 }
 0x8ec   : > { %v1021_v2 = vmul.f32 %v1410_v5, %v1020_v1 }
 0x8ee   : > { %v1025_v3 = vsel %vm1024_vm12, %v1410_v5, %v1021_v2 }
 0x8ef   : > { %v1026_v4 = vmul.f32 %v1025_v3, %v1009_v56 }
 0x8f1   : > { %v1027_v55 = vmul.f32 %v1026_v4, %v885_v34  ;;  %1033 = sbr.rel (%p1278_p1) target bundleno = 2295 (0x8f7), region = 60 }
 0x8f3   : > { %v1028_v6 = vadd.f32 %v1027_v55, %v887_v29 }
 0x8f5   : > { %1029 = vst.msk [vmem:[#allocation2] sm:$0xff] %vm455_vm1, %v1028_v6 }
 0x8f6   : > { %1034 = vst.msk [vmem:[%s392_s2] sm:$0xff] %vm455_vm1, %v1028_v6 }
 0x8f7 PF: > { %s1280_s25 = sshll.u32 %s1493_s9, 3  ;;  %s1844_s8 = sld [smem:[#allocation17_spill]] }
 0x8f8   : > { %s1048_s22 = sshll.u32 %s392_s2, 4  ;;  %s1845_s30 = sand.u32 1, %s1481_s28   ;;  %s1049_s22 = int_to_ptr.vmem [resolvable:$true] %s1048_s22 }
 0x8f9   : > { %s1036_s20 = scalar_lea.sflag [#allocation4], %s1845_s30 }
 0x8fd   : > { %s1046_s12 = scalar_lea.hbm %s1844_s8, %s1280_s25  ;;  %s1431_s15 = scalar_lea.hbm %s1844_s8, 16 }
 0x8fe   : > { %s1050_s19 = sshll.u32 %s1046_s12, 4  ;;  %s1051_s19 = int_to_ptr.hbm [resolvable:$true] %s1050_s19 }
 0x8ff   : > { %s1425_s24 = sshra.s32 %s1051_s19, 4  ;;  %s1426_s24 = int_to_ptr.hbm [resolvable:$true] %s1425_s24 }
 0x900   : > { %s1427_s13 = scalar_lea.hbm %s1426_s24, 8  ;;  %p1432_p6 = scmp.lt.s32.totalorder %s1426_s24, %s1844_s8 }
 0x901   : > { %p1428_p2 = scmp.ne.s32.totalorder %s1426_s24, %s1427_s13  ;;  %p1433_p7 = scmp.lt.s32.totalorder %s1431_s15, %s1427_s13 }
 0x903   : > { %p1429_p4 = pnand %p1428_p2, %p1617_p3  ;;  %p1434_p8 = por %p1433_p7, %p1432_p6 }
 0x905   : > { %p1430_p5 = pneg %p1429_p4 }
 0x907   : > { %p1435_p10 = pnand %p1434_p8, %p1430_p5 }
 0x909   : > { %1438 = shalt.err (!%p1435_p10)
}
 0x90a   : > { %1301 = dma.vmem_to_hbm [thread:$0]  (%p1617_p3), %s1049_s22, 128, %s1051_s19, %s1036_s20  }
 0x90b PF: > { %s1846_s2 = sld [smem:[#allocation10_spill]] }
 0x90c   : > { %s1847_s23 = sld [smem:[#allocation6_spill]] }
 0x911   : > { %p1307_p11 = scmp.ge.s32.totalorder %s1846_s2, 2 }
 0x912   : > { %s1062_s18 = sand.u32 1, %s1847_s23  }
 0x913   : > { %p1304_p12 = pnand %p1307_p11, %p1627_p9  ;;  %s1063_s0 = scalar_lea.sflag [#allocation4], %s1062_s18 }
 0x915   : > { %p1305_p13 = pneg %p1304_p12 }
 0x917   : > { %1472 = dma.done.wait (%p1305_p13), %s1063_s0, 128  }
 0x918   : > { %1474 = vsyncadd (%p1305_p13), %s1063_s0, 4294967168  ;;  %s21_s12 = sadd.s32 1, %s1846_s2   ;;  %s1849_s21 = sld [smem:[#allocation7_spill]] }
 0x919   : > { %p18_p0 = scmp.ge.s32.totalorder %s21_s12, 6   ;;  %s1850_s29 = sld [smem:[#allocation14_spill]] }
 0x91a   : > { %s1851_s30 = sld [smem:[#allocation8_spill]]  ;;  %s1855_s27 = smov %s1481_s28 }
 0x91b   : > { %s1852_s9 = sld [smem:[#allocation9_spill]]  ;;  %20 = sbr.rel (!%p18_p0) target bundleno = 9 (0x9), region = 113 }
 0x91c   : > { %s1853_s10 = sld [smem:[#allocation11_spill]] }
 0x91d   : > { %s1854_s11 = sld [smem:[#allocation12_spill]] }
 0x91e   : > { %s1856_s28 = smov %s1849_s21 }
 0x920   :  { %1069 = vsyncpa [#allocation4], 1 }
 0x921   :  { %1071 = vsyncpa [#allocation4 + $0x1], 1 }

</bundles_post_ra>
